<compile_context>
chip_gen: v5e
topology: v5e:2x2
jax: 0.10.0
libtpu: 0.0.40
codegen_flags: <defaults>
</compile_context>

<pallas_src>
import functools

import jax
import jax.numpy as jnp
from jax.experimental import pallas as pl
from jax.experimental.pallas import tpu as pltpu


def _round_up(a: int, b: int) -> int:
    return (a + b - 1) // b * b


# ---------------------------------------------------------------------------
# Phase 1: global average pool  (N*C, HW) -> (N*C, 1), f32 accumulation.
# ---------------------------------------------------------------------------
def _pool_kernel(x_ref, o_ref, acc_ref, *, inv_hw):
    k = pl.program_id(1)

    @pl.when(k == 0)
    def _():
        acc_ref[...] = jnp.zeros_like(acc_ref)

    # Partial sum over this spatial tile (accumulate in f32).
    acc_ref[...] += jnp.sum(x_ref[...].astype(jnp.float32), axis=-1,
                            keepdims=True)

    @pl.when(k == pl.num_programs(1) - 1)
    def _():
        o_ref[...] = (acc_ref[...] * inv_hw).astype(o_ref.dtype)


# ---------------------------------------------------------------------------
# Phase 2: broadcast-multiply  out = x * gate,  gate is (rows, 1).
# ---------------------------------------------------------------------------
def _scale_kernel(x_ref, g_ref, o_ref):
    o_ref[...] = (x_ref[...] * g_ref[...]).astype(o_ref.dtype)


def cse_forward(U, w_squeeze, w_excite, *, row_tile_cap=256, hw_tile_cap=2048):
    """U: (N, C, H, W).  Returns U * sigmoid(W2 @ (W1 @ avgpool(U)))."""
    N, C, H, W = U.shape
    HW = H * W
    rows = N * C

    # --- tiling / padding ---------------------------------------------------
    rows_p8 = _round_up(rows, 8)                 # f32 sublane multiple
    row_tile = min(row_tile_cap, rows_p8)        # multiple of 8
    rows_pad = _round_up(rows_p8, row_tile)

    hw_p128 = _round_up(HW, 128)                 # lane multiple (unmasked vst)
    hw_tile = min(hw_tile_cap, hw_p128)          # multiple of 128
    hw_pad = _round_up(hw_p128, hw_tile)

    x2d = U.reshape(rows, HW)
    if rows_pad != rows or hw_pad != HW:
        # Only materialize the padded copy when the shape actually needs it.
        x2d = jnp.pad(x2d, ((0, rows_pad - rows), (0, hw_pad - HW)))

    grid = (rows_pad // row_tile, hw_pad // hw_tile)

    # --- Phase 1: pooled means (Pallas, spatially tiled reduction) ----------
    pooled = pl.pallas_call(
        functools.partial(_pool_kernel, inv_hw=1.0 / float(HW)),
        out_shape=jax.ShapeDtypeStruct((rows_pad, 1), jnp.float32),
        grid_spec=pltpu.PrefetchScalarGridSpec(
            num_scalar_prefetch=0,
            grid=grid,
            in_specs=[pl.BlockSpec((row_tile, hw_tile), lambda i, k: (i, k))],
            out_specs=pl.BlockSpec((row_tile, 1), lambda i, k: (i, 0)),
            scratch_shapes=[pltpu.VMEM((row_tile, 1), jnp.float32)],
        ),
        compiler_params=pltpu.CompilerParams(
            dimension_semantics=("parallel", "arbitrary")),
    )(x2d)

    # --- Gate: tiny batched matmuls + sigmoid (plain XLA, negligible) -------
    pooled_nc = pooled[:rows, 0].reshape(N, C)                       # (N, C)
    z1 = jax.lax.dot_general(pooled_nc, w_squeeze.astype(jnp.float32),
                             (((1,), (1,)), ((), ())))               # (N, C//2)
    z2 = jax.lax.dot_general(z1, w_excite.astype(jnp.float32),
                             (((1,), (1,)), ((), ())))               # (N, C)
    gate = jax.nn.sigmoid(z2).reshape(rows, 1)                       # (N*C, 1)
    if rows_pad != rows:
        gate = jnp.pad(gate, ((0, rows_pad - rows), (0, 0)))

    # --- Phase 2: HBM-bound scale pass (Pallas, lane-dense tiles) -----------
    out2d = pl.pallas_call(
        _scale_kernel,
        out_shape=jax.ShapeDtypeStruct((rows_pad, hw_pad), U.dtype),
        grid_spec=pltpu.PrefetchScalarGridSpec(
            num_scalar_prefetch=0,
            grid=grid,
            in_specs=[pl.BlockSpec((row_tile, hw_tile), lambda i, j: (i, j)),
                      pl.BlockSpec((row_tile, 1), lambda i, j: (i, 0))],
            out_specs=pl.BlockSpec((row_tile, hw_tile), lambda i, j: (i, j)),
        ),
        compiler_params=pltpu.CompilerParams(
            dimension_semantics=("parallel", "parallel")),
    )(x2d, gate)

    return out2d[:rows, :HW].reshape(N, C, H, W)


def cse_reference(U, w_squeeze, w_excite):
    # Pure-JAX reference of the PyTorch forward.
    pooled = jnp.mean(U, axis=(2, 3))                     # (N, C)
    z1 = pooled @ w_squeeze.T                             # (N, C//2)
    z2 = z1 @ w_excite.T                                  # (N, C)
    s = jax.nn.sigmoid(z2)                                # (N, C)
    return U * s[:, :, None, None]


if __name__ == "__main__":
    N, C, H, W = 2, 4, 16, 16

    key = jax.random.PRNGKey(0)
    k_u, k_w1, k_w2 = jax.random.split(key, 3)

    U = jax.random.normal(k_u, (N, C, H, W), dtype=jnp.float32)
    # Conv_Squeeze: Conv2d(C, C//2, 1, bias=False) -> weight (C//2, C, 1, 1) ~ (C//2, C)
    w_squeeze = jax.random.normal(k_w1, (C // 2, C), dtype=jnp.float32) * 0.1
    # Conv_Excitation: Conv2d(C//2, C, 1, bias=False) -> weight (C, C//2, 1, 1) ~ (C, C//2)
    w_excite = jax.random.normal(k_w2, (C, C // 2), dtype=jnp.float32) * 0.1

    fwd = jax.jit(cse_forward)
    out = fwd(U, w_squeeze, w_excite)
    out = jax.block_until_ready(out)

    ref = cse_reference(U, w_squeeze, w_excite)
    assert out.shape == (N, C, H, W)
    assert jnp.allclose(out, ref, atol=1e-5, rtol=1e-5)

    print("KERNEL_OK")
</pallas_src>

<mosaic_0001>
module attributes {stable_mosaic.version = 11 : i64} {
  func.func @_pool_kernel(%arg0: i32, %arg1: i32, %arg2: memref<8x256xf32, #tpu.memory_space<vmem>>, %arg3: memref<8x1xf32, #tpu.memory_space<vmem>>, %arg4: memref<8x1xf32, #tpu.memory_space<vmem>>) attributes {dimension_semantics = [#tpu.dimension_semantics<parallel>, #tpu.dimension_semantics<arbitrary>], iteration_bounds = array<i64: 1, 1>, scalar_prefetch = 0 : i64, scratch_operands = 1 : i64, tpu.core_type = #tpu.core_type<tc>, window_params = [{transform_indices = @transform_0, window_bounds = array<i64: 8, 256>}, {transform_indices = @transform_1, window_bounds = array<i64: 8, 1>}]} {
    %c0_i32 = arith.constant 0 : i32
    %0 = arith.cmpi eq, %arg1, %c0_i32 : i32
    %1 = arith.extui %0 : i1 to i32
    %c0_i32_0 = arith.constant 0 : i32
    %2 = arith.cmpi ne, %1, %c0_i32_0 : i32
    scf.if %2 {
      %cst_8 = arith.constant 0.000000e+00 : f32
      %12 = vector.broadcast %cst_8 : f32 to vector<8x1xf32>
      %c0_9 = arith.constant 0 : index
      %c0_10 = arith.constant 0 : index
      %13 = vector.load %arg4[%c0_9, %c0_10] : memref<8x1xf32, #tpu.memory_space<vmem>>, vector<8x1xf32>
      tpu.vector_store %arg4[%c0_9, %c0_10], %12 {strides = array<i32>} : memref<8x1xf32, #tpu.memory_space<vmem>>, vector<8x1xf32>,
    } else {
    }
    %c0 = arith.constant 0 : index
    %c0_1 = arith.constant 0 : index
    %3 = vector.load %arg4[%c0, %c0_1] : memref<8x1xf32, #tpu.memory_space<vmem>>, vector<8x1xf32>
    %c0_2 = arith.constant 0 : index
    %c0_3 = arith.constant 0 : index
    %4 = vector.load %arg2[%c0_2, %c0_3] : memref<8x256xf32, #tpu.memory_space<vmem>>, vector<8x256xf32>
    %cst = arith.constant dense<0.000000e+00> : vector<8xf32>
    %5 = vector.multi_reduction <add>, %4, %cst [1] : vector<8x256xf32> to vector<8xf32>
    %6 = vector.shape_cast %5 : vector<8xf32> to vector<8x1xf32>
    %7 = arith.addf %3, %6 : vector<8x1xf32>
    %c0_4 = arith.constant 0 : index
    %c0_5 = arith.constant 0 : index
    %8 = vector.load %arg4[%c0_4, %c0_5] : memref<8x1xf32, #tpu.memory_space<vmem>>, vector<8x1xf32>
    tpu.vector_store %arg4[%c0_4, %c0_5], %7 {strides = array<i32>} : memref<8x1xf32, #tpu.memory_space<vmem>>, vector<8x1xf32>,
    %c0_i32_6 = arith.constant 0 : i32
    %9 = arith.cmpi eq, %arg1, %c0_i32_6 : i32
    %10 = arith.extui %9 : i1 to i32
    %c0_i32_7 = arith.constant 0 : i32
    %11 = arith.cmpi ne, %10, %c0_i32_7 : i32
    scf.if %11 {
      %c0_8 = arith.constant 0 : index
      %c0_9 = arith.constant 0 : index
      %12 = vector.load %arg4[%c0_8, %c0_9] : memref<8x1xf32, #tpu.memory_space<vmem>>, vector<8x1xf32>
      %cst_10 = arith.constant 3.906250e-03 : f32
      %13 = vector.broadcast %cst_10 : f32 to vector<8x1xf32>
      %14 = arith.mulf %12, %13 : vector<8x1xf32>
      %c0_11 = arith.constant 0 : index
      %c0_12 = arith.constant 0 : index
      %15 = vector.load %arg3[%c0_11, %c0_12] : memref<8x1xf32, #tpu.memory_space<vmem>>, vector<8x1xf32>
      tpu.vector_store %arg3[%c0_11, %c0_12], %14 {strides = array<i32>} : memref<8x1xf32, #tpu.memory_space<vmem>>, vector<8x1xf32>,
    } else {
    }
    return
  }
  func.func @transform_0(%arg0: i32, %arg1: i32) -> (i32, i32) {
    %c0_i32 = arith.constant 0 : i32
    return %arg0, %arg1 : i32, i32
  }
  func.func @transform_1(%arg0: i32, %arg1: i32) -> (i32, i32) {
    %c0_i32 = arith.constant 0 : i32
    %c0_i32_0 = arith.constant 0 : i32
    return %arg0, %c0_i32 : i32, i32
  }
}

module attributes {stable_mosaic.version = 11 : i64} {
  func.func @_scale_kernel(%arg0: i32, %arg1: i32, %arg2: memref<8x256xf32, #tpu.memory_space<vmem>>, %arg3: memref<8x1xf32, #tpu.memory_space<vmem>>, %arg4: memref<8x256xf32, #tpu.memory_space<vmem>>) attributes {dimension_semantics = [#tpu.dimension_semantics<parallel>, #tpu.dimension_semantics<parallel>], iteration_bounds = array<i64: 1, 1>, scalar_prefetch = 0 : i64, scratch_operands = 0 : i64, tpu.core_type = #tpu.core_type<tc>, window_params = [{transform_indices = @transform_0, window_bounds = array<i64: 8, 256>}, {transform_indices = @transform_1, window_bounds = array<i64: 8, 1>}, {transform_indices = @transform_2, window_bounds = array<i64: 8, 256>}]} {
    %c0 = arith.constant 0 : index
    %c0_0 = arith.constant 0 : index
    %0 = vector.load %arg2[%c0, %c0_0] : memref<8x256xf32, #tpu.memory_space<vmem>>, vector<8x256xf32>
    %c0_1 = arith.constant 0 : index
    %c0_2 = arith.constant 0 : index
    %1 = vector.load %arg3[%c0_1, %c0_2] : memref<8x1xf32, #tpu.memory_space<vmem>>, vector<8x1xf32>
    %2 = vector.broadcast %1 : vector<8x1xf32> to vector<8x256xf32>
    %3 = arith.mulf %0, %2 : vector<8x256xf32>
    %c0_3 = arith.constant 0 : index
    %c0_4 = arith.constant 0 : index
    %4 = vector.load %arg4[%c0_3, %c0_4] : memref<8x256xf32, #tpu.memory_space<vmem>>, vector<8x256xf32>
    tpu.vector_store %arg4[%c0_3, %c0_4], %3 {strides = array<i32>} : memref<8x256xf32, #tpu.memory_space<vmem>>, vector<8x256xf32>,
    return
  }
  func.func @transform_0(%arg0: i32, %arg1: i32) -> (i32, i32) {
    %c0_i32 = arith.constant 0 : i32
    return %arg0, %arg1 : i32, i32
  }
  func.func @transform_1(%arg0: i32, %arg1: i32) -> (i32, i32) {
    %c0_i32 = arith.constant 0 : i32
    %c0_i32_0 = arith.constant 0 : i32
    return %arg0, %c0_i32 : i32, i32
  }
  func.func @transform_2(%arg0: i32, %arg1: i32) -> (i32, i32) {
    %c0_i32 = arith.constant 0 : i32
    return %arg0, %arg1 : i32, i32
  }
}

</mosaic_0001>

<bundles_post_ra>
// kernel: squeeze.1
= control target key start
LH: loop header
LB: loop body
LE: loop exit
PB: predicated region body
PF: predicated region fallthrough
CT: control target
= control target key end

     0   :  { %vm18_vm0 = vcmask 31744   ;;  %s51_s0 = inlined_call_operand.vmem [shape: bf16[8], index: 0, kind: input, shape index: {}]   ;;  %s52_s1 = inlined_call_operand.vmem [shape: bf16[2,4], index: 1, kind: output, shape index: {}]  }
   0x1   :  { %v13_v0 = vld [vmem:[%s51_s0] sm:$0x1]  ;;  %s34_s0 = smov 124  }
   0x2   :  { %v14_v1 = vunpack.c.l.bf16 %v13_v0 }
   0x4   :  { %16 = vst [vmem:[#allocation1] sm:$0x3] %v14_v1 }
   0xb   :  { %v20_v2 = vld [vmem:[#allocation1] sm:$0x1]  }
   0xc   :  { %v17_v3 = vld [vmem:[#allocation1] sm:$0x1]   ;;  %21 = vrot.lane.b32.xlu0 %v20_v2, %s34_s0 }
   0xd   :  { %19 = vst.msk [vmem:[#allocation0] sm:$0x1] %vm18_vm0, %v17_v3  }
  0x7e   :  { %v22_v4 = vpop.permute.xlu0 %21  }
  0x7f   :  { %25 = vst.msk [vmem:[#allocation0 + $0x1] sm:$0x1] %vm18_vm0, %v22_v4  }
  0x86   :  { %v28_v5 = vld [vmem:[#allocation0] sm:$0x3] }
  0x87   :  { %v29_v6 = vpack.c.bf16 0.0, %v28_v5 }
  0x89   :  { %32 = vst [vmem:[%s52_s1] sm:$0x1] %v29_v6 }

// kernel: cse_forward.2
= control target key start
LH: loop header
LB: loop body
LE: loop exit
PB: predicated region body
PF: predicated region fallthrough
CT: control target
= control target key end

     0   :  { %vm12_vm0 = vcmask 7168   ;;  %v34_v2 = vmov 0.0   ;;  %s54_s0 = inlined_call_operand.vmem [shape: f32[8,256], index: 0, kind: input, shape index: {}]   ;;  %s55_s1 = inlined_call_operand.vmem [shape: f32[8,1], index: 1, kind: output, shape index: {}]  }
   0x1   :  { %v15_v0 = vld [vmem:[%s54_s0] sm:$0xff]  ;;  %v16_v1 = vld [vmem:[%s54_s0 + $0x8] sm:$0xff]  ;;  %13 = vst.msk [vmem:[#allocation2] sm:$0xff] %vm12_vm0, %v34_v2 }
   0x2   :  { %v17_v3 = vadd.f32 %v16_v1, %v15_v0 }
   0x4   :  { %18 = vadd.xlane.f32.xlu0 %v17_v3 }
   0x8   :  { %v14_v4 = vld [vmem:[#allocation2] sm:$0xff] }
  0x77   :  { %v19_v5 = vpop.xlane.xlu0 %18 }
  0x78   :  { %v20_v6 = vadd.f32 %v19_v5, %v14_v4 }
  0x7a   :  { %22 = vst.msk [vmem:[#allocation2] sm:$0xff] %vm12_vm0, %v20_v6 }
  0x81   :  { %v26_v7 = vld [vmem:[#allocation2] sm:$0xff] }
  0x82   :  { %v27_v8 = vmul.f32 0.00390625, %v26_v7 }
  0x84   :  { %28 = vst.msk [vmem:[%s55_s1] sm:$0xff] %vm12_vm0, %v27_v8 }

// kernel: cse_forward.3
= control target key start
LH: loop header
LB: loop body
LE: loop exit
PB: predicated region body
PF: predicated region fallthrough
CT: control target
= control target key end

     0   :  { %v29_v0 = vmov 0   ;;  %s60_s1 = inlined_call_operand.vmem [shape: f32[8,1], index: 1, kind: input, shape index: {}]   ;;  %s61_s0 = inlined_call_operand.vmem [shape: f32[8,256], index: 0, kind: input, shape index: {}]   ;;  %s62_s2 = inlined_call_operand.vmem [shape: f32[8,256], index: 2, kind: output, shape index: {}]  }
   0x1   :  { %28 = vset.pattern.permute.xlu0 %v29_v0  ;;  %v13_v1 = vld [vmem:[%s60_s1] sm:$0xff]  ;;  %v12_v3 = vld [vmem:[%s61_s0 + $0x8] sm:$0xff] }
   0x2   :  { %16 = vperm.xlu0 %28, %v13_v1   ;;  %v11_v2 = vld [vmem:[%s61_s0] sm:$0xff] }
  0x74   :  { %v17_v4 = vpop.permute.xlu0 %16 }
  0x75   :  { %v19_v5 = vmul.f32 %v17_v4, %v11_v2  ;;  %v20_v6 = vmul.f32 %v17_v4, %v12_v3 }
  0x77   :  { %21 = vst [vmem:[%s62_s2] sm:$0xff] %v19_v5 }
  0x78   :  { %22 = vst [vmem:[%s62_s2 + $0x8] sm:$0xff] %v20_v6 }

</bundles_post_ra>
